<compile_context>
chip_gen: v6e
topology: v6e:2x2x1
jax: 0.10.0
libtpu: 0.0.40
codegen_flags: <defaults>
</compile_context>

<pallas_src>
import functools
import math

import numpy as np
import jax
import jax.numpy as jnp
from jax.experimental import pallas as pl
from jax.experimental.pallas import tpu as pltpu

# feature-group boundaries (same constants as the PyTorch module)
_NO_SIZE = 3
_PT_SIZE = 6
_MAV_SIZE = 9
_TTD_SIZE = 11
_EPS = 1e-5  # InstanceNorm1d default eps
_GROUPS = ((0, _NO_SIZE), (_NO_SIZE, _PT_SIZE),
           (_PT_SIZE, _MAV_SIZE), (_MAV_SIZE, _TTD_SIZE))

_LAYER_SIZES = (48, 36, 36, 24, 24, 12)  # hidden layer widths
_NUM_LINEAR = 7


def _round_up(n, m):
    return ((n + m - 1) // m) * m


def _forward_kernel(input_size, x_ref, w_ref, b_ref, gm_ref, ind_ref, out_ref):
    """All refs are lane-dense (last dim = W = 128):
       x_ref   [TB, W] f32   features zero-padded beyond input_size
       w_ref   [7, W, W] bf16 pre-transposed [in, out], zero-padded, resident
       b_ref   [7, W]  f32   zero-padded
       gm_ref  [W, W]  f32   x @ gm -> per-group mean / E[x^2] (4 real groups)
       ind_ref [W, W]  f32   group stats -> per-feature broadcast-back
       out_ref [TB, W] f32   cols >= output_size stay 0; sliced in wrapper."""
    x = x_ref[...]
    TB, W = x.shape

    # Pass-through mask for columns [_TTD_SIZE, input_size): built from iota,
    # costs a couple of VPU ops instead of an extra DMA'd constant.
    col = jax.lax.broadcasted_iota(jnp.int32, (TB, W), 1)
    pass_c = jnp.where((col >= _TTD_SIZE) & (col < input_size), 1.0, 0.0)

    # ---- single-pass InstanceNorm1d over the 4 feature groups ----
    # Stack [x ; x*x] along the batch axis -> ONE MXU pass for mean & E[x^2];
    # stack [mean ; inv] -> ONE MXU pass for the broadcast-back.
    gm = gm_ref[...]
    ind = ind_ref[...]
    stats = jnp.dot(jnp.concatenate([x, x * x], axis=0), gm,
                    preferred_element_type=jnp.float32)          # [2TB, W]
    mean_g = stats[:TB]
    ex2_g = stats[TB:]
    # Unused / padded group columns give rsqrt(eps) ~ 316; harmless because
    # their `ind` rows are all zero (keep that invariant if editing ind).
    inv_g = jax.lax.rsqrt(ex2_g - mean_g * mean_g + _EPS)
    bcast = jnp.dot(jnp.concatenate([mean_g, inv_g], axis=0), ind,
                    preferred_element_type=jnp.float32)          # [2TB, W]
    mean_b = bcast[:TB]
    inv_b = bcast[TB:]
    # inv_b / mean_b are exactly 0 on pass-through and padded columns.
    h = (x - mean_b) * inv_b + x * pass_c

    # ---- MLP: 6 x (Linear + Tanh) + final Linear ----
    # bf16 operands -> native MXU path with f32 accumulation; bias add + tanh
    # in f32 (v5e VPU/EUP have no bf16; on v6e/v7x the delta is micro).
    b_all = b_ref[...]                                           # [7, W]
    for i in range(_NUM_LINEAR):
        h = jnp.dot(h.astype(jnp.bfloat16), w_ref[i],
                    preferred_element_type=jnp.float32) + b_all[i:i + 1, :]
        if i < _NUM_LINEAR - 1:
            h = jnp.tanh(h)
    # Padded lanes stay exactly 0: padded weights/biases are 0, tanh(0)=0.
    out_ref[...] = h.astype(out_ref.dtype)


def init_params(key, input_size, output_size):
    """Deterministic init matching torch.nn.Linear default U(-1/sqrt(in), 1/sqrt(in)).
    Returns torch-layout params: weight [out, in], bias [out]."""
    dims = (input_size,) + _LAYER_SIZES + (output_size,)
    weights, biases = [], []
    for i in range(_NUM_LINEAR):
        fan_in, fan_out = dims[i], dims[i + 1]
        key, kw, kb = jax.random.split(key, 3)
        bound = 1.0 / math.sqrt(fan_in)
        weights.append(jax.random.uniform(kw, (fan_out, fan_in), jnp.float32,
                                          minval=-bound, maxval=bound))
        biases.append(jax.random.uniform(kb, (fan_out,), jnp.float32,
                                         minval=-bound, maxval=bound))
    return weights, biases


def pack_params(weights, biases):
    """ONE-TIME repack: transpose torch-layout weights to [in, out], zero-pad to
    a common lane-dense width, stack into one bf16 weight buffer + one f32 bias
    buffer, and bake the group-norm constants at the same width.  The per-call
    path then has no parameter-shuffling XLA ops and only 5 kernel inputs."""
    input_size = weights[0].shape[1]
    output_size = weights[-1].shape[0]
    width = _round_up(max(input_size, output_size, *_LAYER_SIZES), 128)

    w_pack = np.zeros((_NUM_LINEAR, width, width), np.float32)
    b_pack = np.zeros((_NUM_LINEAR, width), np.float32)
    for i, (w, b) in enumerate(zip(weights, biases)):
        w_np = np.asarray(w)
        fo, fi = w_np.shape
        w_pack[i, :fi, :fo] = w_np.T
        b_pack[i, :fo] = np.asarray(b)

    # group-norm constants: passed as kernel INPUTS (Pallas rejects non-scalar
    # constants captured inside the kernel body).
    gm = np.zeros((width, width), np.float32)    # x @ gm -> per-group stats
    ind = np.zeros((width, width), np.float32)   # stats -> feature broadcast
    for g, (s, e) in enumerate(_GROUPS):
        gm[s:e, g] = 1.0 / float(e - s)
        ind[g, s:e] = 1.0

    return (jnp.asarray(w_pack, dtype=jnp.bfloat16),
            jnp.asarray(b_pack, dtype=jnp.float32),
            jnp.asarray(gm), jnp.asarray(ind),
            output_size)


@functools.partial(jax.jit, static_argnames=("output_size",))
def bulid_network_validated_forward(x, w_pack, b_pack, gm, ind, *, output_size):
    """x: [B, 1, F] float32 (NCL, single channel). Returns [B, output_size] f32."""
    B, C, F = x.shape
    assert C == 1, "module squeezes dim 1; channel dim must be 1"
    W = w_pack.shape[-1]
    x2 = x.reshape(B, F).astype(jnp.float32)

    # lane-dense layout plumbing done once here (no in-kernel concatenate):
    # pad features to W=128 and pad batch to a multiple of the batch tile.
    TB = min(512, _round_up(B, 8))
    B_pad = _round_up(B, TB)
    x_pad = jnp.pad(x2, ((0, B_pad - B), (0, W - F)))

    kernel = functools.partial(_forward_kernel, F)
    grid = (B_pad // TB,)

    flops = 2 * B_pad * W * W * (_NUM_LINEAR + 4)        # MLP + 2 stacked norm matmuls
    transcendentals = B_pad * W * (_NUM_LINEAR - 1)      # tanh
    bytes_accessed = (4 * (x_pad.size + B_pad * W + b_pack.size + gm.size + ind.size)
                      + 2 * w_pack.size)

    out_pad = pl.pallas_call(
        kernel,
        out_shape=jax.ShapeDtypeStruct((B_pad, W), jnp.float32),
        grid=grid,
        in_specs=[
            pl.BlockSpec((TB, W), lambda i: (i, 0)),                  # batch tile
            pl.BlockSpec((_NUM_LINEAR, W, W), lambda i: (0, 0, 0)),   # weights resident
            pl.BlockSpec((_NUM_LINEAR, W), lambda i: (0, 0)),         # biases resident
            pl.BlockSpec((W, W), lambda i: (0, 0)),                   # gm resident
            pl.BlockSpec((W, W), lambda i: (0, 0)),                   # ind resident
        ],
        out_specs=pl.BlockSpec((TB, W), lambda i: (i, 0)),
        compiler_params=pltpu.CompilerParams(
            dimension_semantics=("parallel",)),                       # megacore on v7x
        cost_estimate=pl.CostEstimate(flops=flops,
                                      transcendentals=transcendentals,
                                      bytes_accessed=bytes_accessed),
    )(x_pad, w_pack, b_pack, gm, ind)

    return out_pad[:B, :output_size]


def _reference_forward(x, weights, biases, *, matmul_dtype=jnp.float32,
                       kernel_var_formula=False):
    """Pure-JAX reference mirroring the PyTorch module.
    With matmul_dtype=bfloat16 and kernel_var_formula=True it mirrors the
    kernel's arithmetic (bf16 MXU inputs, E[x^2]-mean^2 variance)."""
    B, C, F = x.shape
    x2 = x.reshape(B, F)
    segs = []
    for s, e in _GROUPS:
        g = x2[:, s:e]
        m = g.mean(axis=-1, keepdims=True)
        if kernel_var_formula:
            v = (g * g).mean(axis=-1, keepdims=True) - m * m
        else:
            v = ((g - m) ** 2).mean(axis=-1, keepdims=True)
        segs.append((g - m) * jax.lax.rsqrt(v + _EPS))
    segs.append(x2[:, _TTD_SIZE:])
    h = jnp.concatenate(segs, axis=1)
    for i in range(_NUM_LINEAR):
        h = jnp.dot(h.astype(matmul_dtype), weights[i].T.astype(matmul_dtype),
                    preferred_element_type=jnp.float32) + biases[i]
        if i < _NUM_LINEAR - 1:
            h = jnp.tanh(h)
    return h


if __name__ == "__main__":
    B = 8            # batch
    INPUT_SIZE = 16  # 11 structured features + 5 "rest" features
    OUTPUT_SIZE = 4

    key = jax.random.PRNGKey(0)
    key, kx, kp = jax.random.split(key, 3)
    x = jax.random.normal(kx, (B, 1, INPUT_SIZE), jnp.float32)
    weights, biases = init_params(kp, INPUT_SIZE, OUTPUT_SIZE)
    w_pack, b_pack, gm, ind, out_size = pack_params(weights, biases)  # one-time repack

    out = bulid_network_validated_forward(x, w_pack, b_pack, gm, ind,
                                          output_size=out_size)
    out = jax.block_until_ready(out)
    assert out.shape == (B, OUTPUT_SIZE)

    # tight check vs a reference that mirrors the kernel's bf16-matmul math
    ref_bf16 = _reference_forward(x, weights, biases,
                                  matmul_dtype=jnp.bfloat16,
                                  kernel_var_formula=True)
    assert jnp.allclose(out, ref_bf16, atol=2e-2, rtol=2e-2), \
        "mismatch vs bf16 kernel-math reference"

    # sanity check vs exact f32 PyTorch semantics (bf16 MXU rounding budget)
    ref_f32 = _reference_forward(x, weights, biases)
    assert jnp.allclose(out, ref_f32, atol=5e-2, rtol=5e-2), \
        "mismatch vs f32 reference"

    print("KERNEL_OK")
</pallas_src>

<mosaic_0001>
module attributes {stable_mosaic.version = 11 : i64} {
  func.func @_forward_kernel(%arg0: i32, %arg1: memref<8x128xf32, #tpu.memory_space<vmem>>, %arg2: memref<7x128x128xbf16, #tpu.memory_space<vmem>>, %arg3: memref<7x128xf32, #tpu.memory_space<vmem>>, %arg4: memref<128x128xf32, #tpu.memory_space<vmem>>, %arg5: memref<128x128xf32, #tpu.memory_space<vmem>>, %arg6: memref<8x128xf32, #tpu.memory_space<vmem>>) attributes {dimension_semantics = [#tpu.dimension_semantics<parallel>], iteration_bounds = array<i64: 1>, scalar_prefetch = 0 : i64, scratch_operands = 0 : i64, tpu.core_type = #tpu.core_type<tc>, window_params = [{transform_indices = @transform_0, window_bounds = array<i64: 8, 128>}, {pipeline_mode = #tpu.pipeline_mode<synchronous>, transform_indices = @transform_1, window_bounds = array<i64: 7, 128, 128>}, {pipeline_mode = #tpu.pipeline_mode<synchronous>, transform_indices = @transform_2, window_bounds = array<i64: 7, 128>}, {pipeline_mode = #tpu.pipeline_mode<synchronous>, transform_indices = @transform_3, window_bounds = array<i64: 128, 128>}, {pipeline_mode = #tpu.pipeline_mode<synchronous>, transform_indices = @transform_4, window_bounds = array<i64: 128, 128>}, {transform_indices = @transform_5, window_bounds = array<i64: 8, 128>}]} {
    %c0 = arith.constant 0 : index
    %c0_0 = arith.constant 0 : index
    %0 = vector.load %arg1[%c0, %c0_0] : memref<8x128xf32, #tpu.memory_space<vmem>>, vector<8x128xf32>
    %1 = tpu.iota {dimensions = array<i32: 1>} : vector<8x128xi32>
    %c11_i32 = arith.constant 11 : i32
    %2 = vector.broadcast %c11_i32 : i32 to vector<8x128xi32>
    %3 = arith.cmpi sge, %1, %2 : vector<8x128xi32>
    %c16_i32 = arith.constant 16 : i32
    %4 = vector.broadcast %c16_i32 : i32 to vector<8x128xi32>
    %5 = arith.cmpi slt, %1, %4 : vector<8x128xi32>
    %6 = arith.andi %3, %5 : vector<8x128xi1>
    %cst = arith.constant 1.000000e+00 : f32
    %cst_1 = arith.constant 0.000000e+00 : f32
    %7 = vector.broadcast %cst : f32 to vector<8x128xf32>
    %8 = vector.broadcast %cst_1 : f32 to vector<8x128xf32>
    %9 = arith.select %6, %7, %8 : vector<8x128xi1>, vector<8x128xf32>
    %c0_2 = arith.constant 0 : index
    %c0_3 = arith.constant 0 : index
    %10 = vector.load %arg4[%c0_2, %c0_3] : memref<128x128xf32, #tpu.memory_space<vmem>>, vector<128x128xf32>
    %c0_4 = arith.constant 0 : index
    %c0_5 = arith.constant 0 : index
    %11 = vector.load %arg5[%c0_4, %c0_5] : memref<128x128xf32, #tpu.memory_space<vmem>>, vector<128x128xf32>
    %12 = arith.mulf %0, %0 : vector<8x128xf32>
    %13 = tpu.concatenate %0, %12 in 0 : vector<8x128xf32>, vector<8x128xf32> -> vector<16x128xf32>
    %cst_6 = arith.constant dense<0.000000e+00> : vector<16x128xf32>
    %14 = tpu.matmul %13, %10, %cst_6 {dimension_numbers = #tpu.dot_dimension_numbers<[1], [0], [0], [1], [0, 0, 1, 1], [], []>} : vector<16x128xf32>, vector<128x128xf32>, vector<16x128xf32> -> vector<16x128xf32>
    %15 = vector.extract_strided_slice %14 {offsets = [0, 0], sizes = [8, 128], strides = [1, 1]} : vector<16x128xf32> to vector<8x128xf32>
    %16 = vector.extract_strided_slice %14 {offsets = [8, 0], sizes = [8, 128], strides = [1, 1]} : vector<16x128xf32> to vector<8x128xf32>
    %17 = arith.mulf %15, %15 : vector<8x128xf32>
    %18 = arith.subf %16, %17 : vector<8x128xf32>
    %cst_7 = arith.constant 9.99999974E-6 : f32
    %19 = vector.broadcast %cst_7 : f32 to vector<8x128xf32>
    %20 = arith.addf %18, %19 : vector<8x128xf32>
    %21 = math.rsqrt %20 : vector<8x128xf32>
    %22 = tpu.concatenate %15, %21 in 0 : vector<8x128xf32>, vector<8x128xf32> -> vector<16x128xf32>
    %cst_8 = arith.constant dense<0.000000e+00> : vector<16x128xf32>
    %23 = tpu.matmul %22, %11, %cst_8 {dimension_numbers = #tpu.dot_dimension_numbers<[1], [0], [0], [1], [0, 0, 1, 1], [], []>} : vector<16x128xf32>, vector<128x128xf32>, vector<16x128xf32> -> vector<16x128xf32>
    %24 = vector.extract_strided_slice %23 {offsets = [0, 0], sizes = [8, 128], strides = [1, 1]} : vector<16x128xf32> to vector<8x128xf32>
    %25 = vector.extract_strided_slice %23 {offsets = [8, 0], sizes = [8, 128], strides = [1, 1]} : vector<16x128xf32> to vector<8x128xf32>
    %26 = arith.subf %0, %24 : vector<8x128xf32>
    %27 = arith.mulf %26, %25 : vector<8x128xf32>
    %28 = arith.mulf %0, %9 : vector<8x128xf32>
    %29 = arith.addf %27, %28 : vector<8x128xf32>
    %c0_9 = arith.constant 0 : index
    %c0_10 = arith.constant 0 : index
    %30 = vector.load %arg3[%c0_9, %c0_10] : memref<7x128xf32, #tpu.memory_space<vmem>>, vector<7x128xf32>
    %31 = arith.truncf %29 : vector<8x128xf32> to vector<8x128xbf16>
    %c0_11 = arith.constant 0 : index
    %c0_12 = arith.constant 0 : index
    %c0_13 = arith.constant 0 : index
    %32 = vector.load %arg2[%c0_11, %c0_12, %c0_13] : memref<7x128x128xbf16, #tpu.memory_space<vmem>>, vector<1x128x128xbf16>
    %33 = vector.shape_cast %32 : vector<1x128x128xbf16> to vector<128x128xbf16>
    %cst_14 = arith.constant dense<0.000000e+00> : vector<8x128xf32>
    %34 = tpu.matmul %31, %33, %cst_14 {dimension_numbers = #tpu.dot_dimension_numbers<[1], [0], [0], [1], [0, 0, 1, 1], [], []>} : vector<8x128xbf16>, vector<128x128xbf16>, vector<8x128xf32> -> vector<8x128xf32>
    %35 = vector.extract_strided_slice %30 {offsets = [0, 0], sizes = [1, 128], strides = [1, 1]} : vector<7x128xf32> to vector<1x128xf32>
    %36 = vector.broadcast %35 : vector<1x128xf32> to vector<8x128xf32>
    %37 = arith.addf %34, %36 : vector<8x128xf32>
    %38 = math.tanh %37 : vector<8x128xf32>
    %39 = arith.truncf %38 : vector<8x128xf32> to vector<8x128xbf16>
    %c1 = arith.constant 1 : index
    %c0_15 = arith.constant 0 : index
    %c0_16 = arith.constant 0 : index
    %40 = vector.load %arg2[%c1, %c0_15, %c0_16] : memref<7x128x128xbf16, #tpu.memory_space<vmem>>, vector<1x128x128xbf16>
    %41 = vector.shape_cast %40 : vector<1x128x128xbf16> to vector<128x128xbf16>
    %cst_17 = arith.constant dense<0.000000e+00> : vector<8x128xf32>
    %42 = tpu.matmul %39, %41, %cst_17 {dimension_numbers = #tpu.dot_dimension_numbers<[1], [0], [0], [1], [0, 0, 1, 1], [], []>} : vector<8x128xbf16>, vector<128x128xbf16>, vector<8x128xf32> -> vector<8x128xf32>
    %43 = vector.extract_strided_slice %30 {offsets = [1, 0], sizes = [1, 128], strides = [1, 1]} : vector<7x128xf32> to vector<1x128xf32>
    %44 = vector.broadcast %43 : vector<1x128xf32> to vector<8x128xf32>
    %45 = arith.addf %42, %44 : vector<8x128xf32>
    %46 = math.tanh %45 : vector<8x128xf32>
    %47 = arith.truncf %46 : vector<8x128xf32> to vector<8x128xbf16>
    %c2 = arith.constant 2 : index
    %c0_18 = arith.constant 0 : index
    %c0_19 = arith.constant 0 : index
    %48 = vector.load %arg2[%c2, %c0_18, %c0_19] : memref<7x128x128xbf16, #tpu.memory_space<vmem>>, vector<1x128x128xbf16>
    %49 = vector.shape_cast %48 : vector<1x128x128xbf16> to vector<128x128xbf16>
    %cst_20 = arith.constant dense<0.000000e+00> : vector<8x128xf32>
    %50 = tpu.matmul %47, %49, %cst_20 {dimension_numbers = #tpu.dot_dimension_numbers<[1], [0], [0], [1], [0, 0, 1, 1], [], []>} : vector<8x128xbf16>, vector<128x128xbf16>, vector<8x128xf32> -> vector<8x128xf32>
    %51 = vector.extract_strided_slice %30 {offsets = [2, 0], sizes = [1, 128], strides = [1, 1]} : vector<7x128xf32> to vector<1x128xf32>
    %52 = vector.broadcast %51 : vector<1x128xf32> to vector<8x128xf32>
    %53 = arith.addf %50, %52 : vector<8x128xf32>
    %54 = math.tanh %53 : vector<8x128xf32>
    %55 = arith.truncf %54 : vector<8x128xf32> to vector<8x128xbf16>
    %c3 = arith.constant 3 : index
    %c0_21 = arith.constant 0 : index
    %c0_22 = arith.constant 0 : index
    %56 = vector.load %arg2[%c3, %c0_21, %c0_22] : memref<7x128x128xbf16, #tpu.memory_space<vmem>>, vector<1x128x128xbf16>
    %57 = vector.shape_cast %56 : vector<1x128x128xbf16> to vector<128x128xbf16>
    %cst_23 = arith.constant dense<0.000000e+00> : vector<8x128xf32>
    %58 = tpu.matmul %55, %57, %cst_23 {dimension_numbers = #tpu.dot_dimension_numbers<[1], [0], [0], [1], [0, 0, 1, 1], [], []>} : vector<8x128xbf16>, vector<128x128xbf16>, vector<8x128xf32> -> vector<8x128xf32>
    %59 = vector.extract_strided_slice %30 {offsets = [3, 0], sizes = [1, 128], strides = [1, 1]} : vector<7x128xf32> to vector<1x128xf32>
    %60 = vector.broadcast %59 : vector<1x128xf32> to vector<8x128xf32>
    %61 = arith.addf %58, %60 : vector<8x128xf32>
    %62 = math.tanh %61 : vector<8x128xf32>
    %63 = arith.truncf %62 : vector<8x128xf32> to vector<8x128xbf16>
    %c4 = arith.constant 4 : index
    %c0_24 = arith.constant 0 : index
    %c0_25 = arith.constant 0 : index
    %64 = vector.load %arg2[%c4, %c0_24, %c0_25] : memref<7x128x128xbf16, #tpu.memory_space<vmem>>, vector<1x128x128xbf16>
    %65 = vector.shape_cast %64 : vector<1x128x128xbf16> to vector<128x128xbf16>
    %cst_26 = arith.constant dense<0.000000e+00> : vector<8x128xf32>
    %66 = tpu.matmul %63, %65, %cst_26 {dimension_numbers = #tpu.dot_dimension_numbers<[1], [0], [0], [1], [0, 0, 1, 1], [], []>} : vector<8x128xbf16>, vector<128x128xbf16>, vector<8x128xf32> -> vector<8x128xf32>
    %67 = vector.extract_strided_slice %30 {offsets = [4, 0], sizes = [1, 128], strides = [1, 1]} : vector<7x128xf32> to vector<1x128xf32>
    %68 = vector.broadcast %67 : vector<1x128xf32> to vector<8x128xf32>
    %69 = arith.addf %66, %68 : vector<8x128xf32>
    %70 = math.tanh %69 : vector<8x128xf32>
    %71 = arith.truncf %70 : vector<8x128xf32> to vector<8x128xbf16>
    %c5 = arith.constant 5 : index
    %c0_27 = arith.constant 0 : index
    %c0_28 = arith.constant 0 : index
    %72 = vector.load %arg2[%c5, %c0_27, %c0_28] : memref<7x128x128xbf16, #tpu.memory_space<vmem>>, vector<1x128x128xbf16>
    %73 = vector.shape_cast %72 : vector<1x128x128xbf16> to vector<128x128xbf16>
    %cst_29 = arith.constant dense<0.000000e+00> : vector<8x128xf32>
    %74 = tpu.matmul %71, %73, %cst_29 {dimension_numbers = #tpu.dot_dimension_numbers<[1], [0], [0], [1], [0, 0, 1, 1], [], []>} : vector<8x128xbf16>, vector<128x128xbf16>, vector<8x128xf32> -> vector<8x128xf32>
    %75 = vector.extract_strided_slice %30 {offsets = [5, 0], sizes = [1, 128], strides = [1, 1]} : vector<7x128xf32> to vector<1x128xf32>
    %76 = vector.broadcast %75 : vector<1x128xf32> to vector<8x128xf32>
    %77 = arith.addf %74, %76 : vector<8x128xf32>
    %78 = math.tanh %77 : vector<8x128xf32>
    %79 = arith.truncf %78 : vector<8x128xf32> to vector<8x128xbf16>
    %c6 = arith.constant 6 : index
    %c0_30 = arith.constant 0 : index
    %c0_31 = arith.constant 0 : index
    %80 = vector.load %arg2[%c6, %c0_30, %c0_31] : memref<7x128x128xbf16, #tpu.memory_space<vmem>>, vector<1x128x128xbf16>
    %81 = vector.shape_cast %80 : vector<1x128x128xbf16> to vector<128x128xbf16>
    %cst_32 = arith.constant dense<0.000000e+00> : vector<8x128xf32>
    %82 = tpu.matmul %79, %81, %cst_32 {dimension_numbers = #tpu.dot_dimension_numbers<[1], [0], [0], [1], [0, 0, 1, 1], [], []>} : vector<8x128xbf16>, vector<128x128xbf16>, vector<8x128xf32> -> vector<8x128xf32>
    %83 = vector.extract_strided_slice %30 {offsets = [6, 0], sizes = [1, 128], strides = [1, 1]} : vector<7x128xf32> to vector<1x128xf32>
    %84 = vector.broadcast %83 : vector<1x128xf32> to vector<8x128xf32>
    %85 = arith.addf %82, %84 : vector<8x128xf32>
    %c0_33 = arith.constant 0 : index
    %c0_34 = arith.constant 0 : index
    %86 = vector.load %arg6[%c0_33, %c0_34] : memref<8x128xf32, #tpu.memory_space<vmem>>, vector<8x128xf32>
    tpu.vector_store %arg6[%c0_33, %c0_34], %85 {strides = array<i32>} : memref<8x128xf32, #tpu.memory_space<vmem>>, vector<8x128xf32>,
    return
  }
  func.func @transform_0(%arg0: i32) -> (i32, i32) {
    %c0_i32 = arith.constant 0 : i32
    %c0_i32_0 = arith.constant 0 : i32
    return %arg0, %c0_i32 : i32, i32
  }
  func.func @transform_1(%arg0: i32) -> (i32, i32, i32) {
    %c0_i32 = arith.constant 0 : i32
    %c0_i32_0 = arith.constant 0 : i32
    %c0_i32_1 = arith.constant 0 : i32
    %c0_i32_2 = arith.constant 0 : i32
    return %c0_i32, %c0_i32_0, %c0_i32_1 : i32, i32, i32
  }
  func.func @transform_2(%arg0: i32) -> (i32, i32) {
    %c0_i32 = arith.constant 0 : i32
    %c0_i32_0 = arith.constant 0 : i32
    %c0_i32_1 = arith.constant 0 : i32
    return %c0_i32, %c0_i32_0 : i32, i32
  }
  func.func @transform_3(%arg0: i32) -> (i32, i32) {
    %c0_i32 = arith.constant 0 : i32
    %c0_i32_0 = arith.constant 0 : i32
    %c0_i32_1 = arith.constant 0 : i32
    return %c0_i32, %c0_i32_0 : i32, i32
  }
  func.func @transform_4(%arg0: i32) -> (i32, i32) {
    %c0_i32 = arith.constant 0 : i32
    %c0_i32_0 = arith.constant 0 : i32
    %c0_i32_1 = arith.constant 0 : i32
    return %c0_i32, %c0_i32_0 : i32, i32
  }
  func.func @transform_5(%arg0: i32) -> (i32, i32) {
    %c0_i32 = arith.constant 0 : i32
    %c0_i32_0 = arith.constant 0 : i32
    return %arg0, %c0_i32 : i32, i32
  }
}

</mosaic_0001>

<bundles_post_ra>
// kernel: bulid_network_validated_forward.1
= control target key start
LH: loop header
LB: loop body
LE: loop exit
PB: predicated region body
PF: predicated region fallthrough
CT: control target
= control target key end

     0   :  { %10 = vsyncpa [#allocation3], 0  ;;  %s1704_s0 = inlined_call_operand.vmem [shape: f32[8,128], index: 0, kind: input, shape index: {}]   ;;  %s1705_s1 = inlined_call_operand.hbm [shape: bf16[7,128,128], index: 1, kind: input, shape index: {}]   ;;  %s1706_s2 = inlined_call_operand.vmem [shape: f32[7,128], index: 2, kind: input, shape index: {}]   ;;  %s1707_s3 = inlined_call_operand.hbm [shape: f32[128,128], index: 3, kind: input, shape index: {}]   ;;  %s1708_s4 = inlined_call_operand.hbm [shape: f32[128,128], index: 4, kind: input, shape index: {}]   ;;  %s1709_s5 = inlined_call_operand.vmem [shape: f32[8,128], index: 5, kind: output, shape index: {}]  }
   0x1   :  { %11 = vsyncpa [#allocation5], 0  ;;  %s1551_s18 = smov [#allocation4]  }
   0x2   :  { %s33_s19 = sshll.u32 %s1551_s18, 4  ;;  %s34_s19 = int_to_ptr.vmem [resolvable:$true] %s33_s19 }
   0x3   :  { %s1495_s20 = scalar_lea.vmem %s34_s19, 2048  ;;  %p1500_p1 = scmp.lt.s32.totalorder %s34_s19, %s34_s19 }
   0x4   :  { %p1496_p0 = scmp.ne.s32.totalorder %s34_s19, %s1495_s20  ;;  %p1501_p2 = scmp.lt.s32.totalorder %s1495_s20, %s1495_s20 }
   0x6   :  { %p1502_p3 = por %p1501_p2, %p1500_p1 }
   0x8   :  { %p1503_p4 = pnand %p1502_p3, %p1496_p0 }
   0xa   :  { %1506 = shalt.err (!%p1503_p4)
}
   0xb   :  { %s1552_s21 = smov 128   ;;  %s1553_s22 = smov 8  }
   0xc   :  { %39 = dma.hbm_to_vmem [thread:$0]  %s1707_s3, 2048, %s34_s19, [#allocation5], %s1552_s21, %s1552_s21, %s1553_s22  }
   0xd   :  { %s1554_s25 = smov [#allocation2]  }
   0xe   :  { %s19_s26 = sshll.u32 %s1554_s25, 4  ;;  %s20_s26 = int_to_ptr.vmem [resolvable:$true] %s19_s26 }
   0xf   :  { %s1515_s27 = scalar_lea.vmem %s20_s26, 7168  ;;  %p1520_p6 = scmp.lt.s32.totalorder %s20_s26, %s20_s26 }
  0x10   :  { %p1516_p5 = scmp.ne.s32.totalorder %s20_s26, %s1515_s27  ;;  %p1521_p7 = scmp.lt.s32.totalorder %s1515_s27, %s1515_s27 }
  0x12   :  { %p1522_p8 = por %p1521_p7, %p1520_p6 }
  0x14   :  { %p1523_p9 = pnand %p1522_p8, %p1516_p5 }
  0x16   :  { %1526 = shalt.err (!%p1523_p9)
}
  0x17   :  { %s1555_s28 = smov 64   ;;  %s1556_s29 = smov 4  }
  0x18   :  { %25 = dma.hbm_to_vmem [thread:$0]  %s1705_s1, 7168, %s20_s26, [#allocation3], %s1555_s28, %s1555_s28, %s1556_s29  }
  0x19   :  { %s1557_s7 = smov [#allocation6]  }
  0x1a   :  { %s45_s8 = sshll.u32 %s1557_s7, 4  ;;  %s46_s8 = int_to_ptr.vmem [resolvable:$true] %s45_s8 }
  0x1b   :  { %s1535_s3 = scalar_lea.vmem %s46_s8, 2048  ;;  %p1540_p11 = scmp.lt.s32.totalorder %s46_s8, %s46_s8 }
  0x1c   :  { %p1536_p10 = scmp.ne.s32.totalorder %s46_s8, %s1535_s3  ;;  %p1541_p12 = scmp.lt.s32.totalorder %s1535_s3, %s1535_s3 }
  0x1e   :  { %p1542_p13 = por %p1541_p12, %p1540_p11 }
  0x20   :  { %p1543_p0 = pnand %p1542_p13, %p1536_p10 }
  0x22   :  { %1546 = shalt.err (!%p1543_p0)
}
  0x23   :  { %51 = dma.hbm_to_vmem [thread:$0]  %s1708_s4, 2048, %s46_s8, [#allocation5], %s1552_s21, %s1552_s21, %s1553_s22  }
  0x24   :  { %1547 = dma.done.wait [#allocation3], 7168  }
  0x25   :  { %1548 = vsyncadd [#allocation3], 4294960128 }
  0x26   :  { %1549 = dma.done.wait [#allocation5], 4096  }
  0x27   :  { %1550 = vsyncadd [#allocation5], 4294963200  ;;  %v84_v0 = vld [vmem:[#allocation4 + $0x78] sm:$0xff]  ;;  %v83_v1 = vld [vmem:[#allocation4 + $0x70] sm:$0xff]  ;;  %v1558_v35 = vmov 0.0   ;;  %vm1559_vm0 = vmmov 0   ;;  %v63_v52 = vlaneseq }
  0x28   :  { %1198 = vmatprep.subr.mxu0 %v84_v0  ;;  %v82_v2 = vld [vmem:[#allocation4 + $0x68] sm:$0xff]  ;;  %v81_v3 = vld [vmem:[#allocation4 + $0x60] sm:$0xff]  ;;  %v100_v5 = vld [vmem:[#allocation6 + $0x78] sm:$0xff] }
  0x29   :  { %1199 = vmatpush3.msra.mxu0 %v84_v0  ;;  %v1602_v4 = vld [vmem:[%s1704_s0] sm:$0xff]  ;;  %v80_v6 = vld [vmem:[#allocation4 + $0x58] sm:$0xff]  ;;  %v79_v7 = vld [vmem:[#allocation4 + $0x50] sm:$0xff]  ;;  %1233 = vmatprep.subr.mxu1 %v100_v5  ;;  %v64_v53 = vand.u32 127, %v63_v52 }
  0x2a   :  { %1200 = vmatprep.subr.mxu0 %v83_v1  ;;  %1230 = vmatprep.mubr.f32.mxu0 %v1602_v4  ;;  %v99_v8 = vld [vmem:[#allocation6 + $0x70] sm:$0xff]  ;;  %v98_v9 = vld [vmem:[#allocation6 + $0x68] sm:$0xff]  ;;  %v97_v11 = vld [vmem:[#allocation6 + $0x60] sm:$0xff]  ;;  %v101_v22 = vmul.f32 %v1602_v4, %v1602_v4 }
  0x2b   :  { %1201 = vmatpush3.msra.mxu0 %v83_v1  ;;  %v78_v10 = vld [vmem:[#allocation4 + $0x48] sm:$0xff]  ;;  %1234 = vmatpush3.msra.mxu1 %v100_v5  ;;  %v77_v12 = vld [vmem:[#allocation4 + $0x40] sm:$0xff]  ;;  %v96_v13 = vld [vmem:[#allocation6 + $0x58] sm:$0xff]  ;;  %vm65_vm1 = vcmp.ge.s32.totalorder %v64_v53, 11  ;;  %vm66_vm2 = vcmp.lt.s32.totalorder %v64_v53, 16 }
  0x2c   :  { %1202 = vmatprep.subr.mxu0 %v82_v2  ;;  %1235 = vmatprep.subr.mxu1 %v99_v8  ;;  %v76_v14 = vld [vmem:[#allocation4 + $0x38] sm:$0xff]  ;;  %v75_v15 = vld [vmem:[#allocation4 + $0x30] sm:$0xff]  ;;  %v74_v16 = vld [vmem:[#allocation4 + $0x28] sm:$0xff] }
  0x2d   :  { %1203 = vmatpush3.msra.mxu0 %v82_v2  ;;  %1236 = vmatpush3.msra.mxu1 %v99_v8  ;;  %v73_v17 = vld [vmem:[#allocation4 + $0x20] sm:$0xff]  ;;  %v72_v18 = vld [vmem:[#allocation4 + $0x18] sm:$0xff]  ;;  %v71_v19 = vld [vmem:[#allocation4 + $0x10] sm:$0xff] }
  0x2e   :  { %1204 = vmatprep.subr.mxu0 %v81_v3  ;;  %1237 = vmatprep.subr.mxu1 %v98_v9  ;;  %v70_v20 = vld [vmem:[#allocation4 + $0x8] sm:$0xff]  ;;  %v69_v21 = vld [vmem:[#allocation4] sm:$0xff]  ;;  %v95_v23 = vld [vmem:[#allocation6 + $0x50] sm:$0xff] }
  0x2f   :  { %1205 = vmatpush3.msra.mxu0 %v81_v3  ;;  %1238 = vmatpush3.msra.mxu1 %v98_v9  ;;  %v94_v24 = vld [vmem:[#allocation6 + $0x48] sm:$0xff]  ;;  %v93_v25 = vld [vmem:[#allocation6 + $0x40] sm:$0xff]  ;;  %v92_v26 = vld [vmem:[#allocation6 + $0x38] sm:$0xff] }
  0x30   :  { %1206 = vmatprep.subr.mxu0 %v80_v6  ;;  %1239 = vmatprep.subr.mxu1 %v97_v11  ;;  %v91_v27 = vld [vmem:[#allocation6 + $0x30] sm:$0xff]  ;;  %v90_v28 = vld [vmem:[#allocation6 + $0x28] sm:$0xff]  ;;  %v89_v29 = vld [vmem:[#allocation6 + $0x20] sm:$0xff] }
  0x31   :  { %1207 = vmatpush3.msra.mxu0 %v80_v6  ;;  %1240 = vmatpush3.msra.mxu1 %v97_v11  ;;  %v88_v30 = vld [vmem:[#allocation6 + $0x18] sm:$0xff]  ;;  %v87_v31 = vld [vmem:[#allocation6 + $0x10] sm:$0xff]  ;;  %v86_v32 = vld [vmem:[#allocation6 + $0x8] sm:$0xff]  ;;  %v1637_v6 = vshrl.u32 %v63_v52, 7 }
  0x32   :  { %1208 = vmatprep.subr.mxu0 %v79_v7  ;;  %1241 = vmatprep.subr.mxu1 %v96_v13  ;;  %v85_v33 = vld [vmem:[#allocation6] sm:$0xff]  ;;  %v1417_v34 = vld [vmem:[#allocation2 + $0x38] sm:$0xff]   ;;  %v1418_v36 = vld [vmem:[#allocation2 + $0x30] sm:$0xff]  }
  0x33   :  { %1209 = vmatpush3.msra.mxu0 %v79_v7  ;;  %1242 = vmatpush3.msra.mxu1 %v96_v13  ;;  %v1419_v37 = vld [vmem:[#allocation2 + $0x28] sm:$0xff]   ;;  %v1420_v38 = vld [vmem:[#allocation2 + $0x20] sm:$0xff]   ;;  %v1421_v39 = vld [vmem:[#allocation2 + $0x18] sm:$0xff]   ;;  %v280_v7 = vsub.s32 0, %v1637_v6 }
  0x34   :  { %1210 = vmatprep.subr.mxu0 %v78_v10  ;;  %1243 = vmatprep.subr.mxu1 %v95_v23  ;;  %v1422_v46 = vld [vmem:[#allocation2 + $0x10] sm:$0xff]   ;;  %v1423_v47 = vld [vmem:[#allocation2 + $0x8] sm:$0xff]   ;;  %v1424_v48 = vld [vmem:[#allocation2] sm:$0xff]  }
  0x35   :  { %1211 = vmatpush3.msra.mxu0 %v78_v10  ;;  %1244 = vmatpush3.msra.mxu1 %v95_v23  ;;  %v1425_v49 = vld [vmem:[#allocation2 + $0x78] sm:$0xff]   ;;  %v1426_v50 = vld [vmem:[#allocation2 + $0x70] sm:$0xff]   ;;  %v1427_v51 = vld [vmem:[#allocation2 + $0x68] sm:$0xff]  }
  0x36   :  { %1212 = vmatprep.subr.mxu0 %v77_v12  ;;  %1245 = vmatprep.subr.mxu1 %v94_v24  ;;  %vm67_vm3 = vmand %vm65_vm1, %vm66_vm2  ;;  %v1428_v62 = vld [vmem:[#allocation2 + $0x60] sm:$0xff]   ;;  %v1429_v63 = vld [vmem:[#allocation2 + $0x58] sm:$0xff]  }
  0x37   :  { %1213 = vmatpush3.msra.mxu0 %v77_v12  ;;  %1246 = vmatpush3.msra.mxu1 %v94_v24  ;;  %v68_v55 = vsel %vm67_vm3, 1.0, %v1558_v35  ;;  %v1430_v0 = vld [vmem:[#allocation2 + $0x50] sm:$0xff]   ;;  %v1431_v1 = vld [vmem:[#allocation2 + $0x48] sm:$0xff]   ;;  %v1432_v2 = vld [vmem:[#allocation2 + $0x40] sm:$0xff]  }
  0x38   :  { %1214 = vmatprep.subr.mxu0 %v76_v14  ;;  %1247 = vmatprep.subr.mxu1 %v93_v25  ;;  %v258_v58 = vmul.f32 %v68_v55, %v1602_v4  ;;  %v1433_v3 = vld [vmem:[#allocation2 + $0xb8] sm:$0xff]   ;;  %v1435_v5 = vld [vmem:[#allocation2 + $0xa8] sm:$0xff]   ;;  %v1643_v8 = vld [vmem:[%s1706_s2] sm:$0x7f] }
  0x39   :  { %1215 = vmatpush3.msra.mxu0 %v76_v14  ;;  %1248 = vmatpush3.msra.mxu1 %v93_v25  ;;  %v281_v9 = vrot.slane %v1643_v8, %v280_v7  ;;  %v1442_v23 = vld [vmem:[#allocation2 + $0xf0] sm:$0xff]   ;;  %v1443_v24 = vld [vmem:[#allocation2 + $0xe8] sm:$0xff]   ;;  %v391_v25 = vsub.s32 1, %v1637_v6  ;;  %v1452_v52 = vld [vmem:[#allocation2 + $0x120] sm:$0xff]  }
  0x3a   :  { %1216 = vmatprep.subr.mxu0 %v75_v15  ;;  %1249 = vmatprep.subr.mxu1 %v92_v26  ;;  %v1453_v53 = vld [vmem:[#allocation2 + $0x118] sm:$0xff]   ;;  %v1455_v55 = vld [vmem:[#allocation2 + $0x108] sm:$0xff]  }
  0x3b   :  { %1217 = vmatpush3.msra.mxu0 %v75_v15  ;;  %1250 = vmatpush3.msra.mxu1 %v92_v26  ;;  %v392_v26 = vrot.slane %v1643_v8, %v391_v25  ;;  %v1461_v7 = vld [vmem:[#allocation2 + $0x158] sm:$0xff]  }
  0x3c   :  { %1218 = vmatprep.subr.mxu0 %v74_v16  ;;  %1251 = vmatprep.subr.mxu1 %v91_v27  ;;  %v1469_v25 = vld [vmem:[#allocation2 + $0x198] sm:$0xff]  }
  0x3d   :  { %1219 = vmatpush3.msra.mxu0 %v74_v16  ;;  %1252 = vmatpush3.msra.mxu1 %v91_v27 }
  0x3e   :  { %1220 = vmatprep.subr.mxu0 %v73_v17  ;;  %1253 = vmatprep.subr.mxu1 %v90_v28 }
  0x3f   :  { %1221 = vmatpush3.msra.mxu0 %v73_v17  ;;  %1254 = vmatpush3.msra.mxu1 %v90_v28  ;;  %v1436_v17 = vld [vmem:[#allocation2 + $0xa0] sm:$0xff]  }
  0x40   :  { %1222 = vmatprep.subr.mxu0 %v72_v18  ;;  %1255 = vmatprep.subr.mxu1 %v89_v29 }
  0x41   :  { %1223 = vmatpush3.msra.mxu0 %v72_v18  ;;  %1256 = vmatpush3.msra.mxu1 %v89_v29  ;;  %v1437_v18 = vld [vmem:[#allocation2 + $0x98] sm:$0xff]  }
  0x42   :  { %1224 = vmatprep.subr.mxu0 %v71_v19  ;;  %1257 = vmatprep.subr.mxu1 %v88_v30 }
  0x43   :  { %1225 = vmatpush3.msra.mxu0 %v71_v19  ;;  %1258 = vmatpush3.msra.mxu1 %v88_v30  ;;  %v1438_v19 = vld [vmem:[#allocation2 + $0x90] sm:$0xff]  }
  0x44   :  { %1226 = vmatprep.subr.mxu0 %v70_v20  ;;  %1259 = vmatprep.subr.mxu1 %v87_v31 }
  0x45   :  { %1227 = vmatpush3.msra.mxu0 %v70_v20  ;;  %1260 = vmatpush3.msra.mxu1 %v87_v31  ;;  %v1439_v20 = vld [vmem:[#allocation2 + $0x88] sm:$0xff]  }
  0x46   :  { %1228 = vmatprep.subr.mxu0 %v69_v21  ;;  %1261 = vmatprep.subr.mxu1 %v86_v32 }
  0x47   :  { %1229 = vmatpush3.msra.mxu0 %v69_v21  ;;  %1262 = vmatpush3.msra.mxu1 %v86_v32  ;;  %v1440_v21 = vld [vmem:[#allocation2 + $0x80] sm:$0xff]  }
  0x48   :  { %1231 = vmatmul.mubr.f32.vlgmr.msra.gmra.mxu0 %v101_v22  ;;  %1263 = vmatprep.subr.mxu1 %v85_v33  ;;  %v1441_v22 = vld [vmem:[#allocation2 + $0xf8] sm:$0xff]  }
  0x49   :  { %1264 = vmatpush3.msra.mxu1 %v85_v33  ;;  %1268 = vmatprep.subr.bf16.mxu0 %v1558_v35 }
  0x4a   :  { %1288 = vmatprep.subr.bf16.mxu1 %v1558_v35  ;;  %1269 = vmatpush3.bf16.msra.mxu0 %v1417_v34  ;;  %v1444_v34 = vld [vmem:[#allocation2 + $0xe0] sm:$0xff]  }
  0x4b   :  { %1270 = vmatprep.subr.bf16.mxu0 %v1558_v35  ;;  %1284 = vmatprep.mubr.msk.bf16.mxu0 %vm1559_vm0, %v1558_v35 }
  0x4e   :  { %1271 = vmatpush3.bf16.msra.mxu0 %v1418_v36  ;;  %v1445_v36 = vld [vmem:[#allocation2 + $0xd8] sm:$0xff]  }
  0x4f   :  { %1272 = vmatprep.subr.bf16.mxu0 %v1558_v35 }
  0x52   :  { %1273 = vmatpush3.bf16.msra.mxu0 %v1419_v37  ;;  %v1446_v37 = vld [vmem:[#allocation2 + $0xd0] sm:$0xff]  }
  0x53   :  { %1274 = vmatprep.subr.bf16.mxu0 %v1558_v35 }
  0x56   :  { %1275 = vmatpush3.bf16.msra.mxu0 %v1420_v38  ;;  %v1447_v38 = vld [vmem:[#allocation2 + $0xc8] sm:$0xff]  }
  0x57   :  { %1276 = vmatprep.subr.bf16.mxu0 %v1558_v35 }
  0x5a   :  { %1277 = vmatpush3.bf16.msra.mxu0 %v1421_v39  ;;  %v1448_v39 = vld [vmem:[#allocation2 + $0xc0] sm:$0xff]  }
  0x5b   :  { %1278 = vmatprep.subr.bf16.mxu0 %v1558_v35 }
  0x5e   :  { %1279 = vmatpush3.bf16.msra.mxu0 %v1422_v46 }
  0x5f   :  { %1280 = vmatprep.subr.bf16.mxu0 %v1558_v35 }
  0x62   :  { %1281 = vmatpush3.bf16.msra.mxu0 %v1423_v47 }
  0x63   :  { %1282 = vmatprep.subr.bf16.mxu0 %v1558_v35 }
  0x66   :  { %1283 = vmatpush3.bf16.msra.mxu0 %v1424_v48 }
  0x67   :  { %1308 = vmatprep.subr.bf16.mxu0 %v1558_v35 }
 0x108   :  { %v1232_v40 = vpop.f32.mrf.mxu0 }
 0x10a   :  { %v168_v41 = vpop.f32.mrf.mxu0 }
 0x10b   :  { %v177_v42 = vmul.f32 %v168_v41, %v168_v41  ;;  %1265 = vmatprep.mubr.f32.mxu1 %v168_v41  ;;  %v1450_v41 = vld [vmem:[#allocation2 + $0x130] sm:$0xff]  }
 0x10d   :  { %v178_v43 = vsub.f32 %v1232_v40, %v177_v42  ;;  %v1449_v40 = vld [vmem:[#allocation2 + $0x138] sm:$0xff]   ;;  %v1451_v42 = vld [vmem:[#allocation2 + $0x128] sm:$0xff]  }
 0x10f   :  { %v179_v44 = vadd.f32 1e-05, %v178_v43  ;;  %v502_v43 = vsub.s32 2, %v1637_v6 }
 0x111   :  { %1473 = vrsqrt.f32 %v179_v44  ;;  %v503_v44 = vrot.slane %v1643_v8, %v502_v43 }
 0x11e   :  { %v1474_v45 = vpop.eup %1473 }
 0x11f   :  { %1266 = vmatmul.mubr.f32.vlgmr.msra.gmra.mxu1 %v1474_v45 }
 0x120   :  { %1304 = vmatprep.mubr.msk.bf16.mxu1 %vm1559_vm0, %v1558_v35  ;;  %1289 = vmatpush3.bf16.msra.mxu1 %v1425_v49 }
 0x121   :  { %1290 = vmatprep.subr.bf16.mxu1 %v1558_v35 }
 0x124   :  { %1291 = vmatpush3.bf16.msra.mxu1 %v1426_v50 }
 0x125   :  { %1292 = vmatprep.subr.bf16.mxu1 %v1558_v35 }
 0x128   :  { %1293 = vmatpush3.bf16.msra.mxu1 %v1427_v51 }
 0x129   :  { %1294 = vmatprep.subr.bf16.mxu1 %v1558_v35 }
 0x12c   :  { %1295 = vmatpush3.bf16.msra.mxu1 %v1428_v62 }
 0x12d   :  { %1296 = vmatprep.subr.bf16.mxu1 %v1558_v35 }
 0x130   :  { %1297 = vmatpush3.bf16.msra.mxu1 %v1429_v63 }
 0x131   :  { %1298 = vmatprep.subr.bf16.mxu1 %v1558_v35 }
 0x134   :  { %1299 = vmatpush3.bf16.msra.mxu1 %v1430_v0 }
 0x135   :  { %1300 = vmatprep.subr.bf16.mxu1 %v1558_v35 }
 0x138   :  { %1301 = vmatpush3.bf16.msra.mxu1 %v1431_v1 }
 0x139   :  { %1302 = vmatprep.subr.bf16.mxu1 %v1558_v35 }
 0x13c   :  { %1303 = vmatpush3.bf16.msra.mxu1 %v1432_v2 }
 0x13d   :  { %1328 = vmatprep.subr.bf16.mxu1 %v1558_v35 }
 0x1df   :  { %v1267_v54 = vpop.f32.mrf.mxu1 }
 0x1e1   :  { %v247_v56 = vpop.f32.mrf.mxu1 }
 0x1e2   :  { %v256_v57 = vsub.f32 %v1602_v4, %v247_v56  ;;  %v1434_v4 = vld [vmem:[#allocation2 + $0xb0] sm:$0xff]   ;;  %v1456_v56 = vld [vmem:[#allocation2 + $0x100] sm:$0xff]  }
 0x1e4   :  { %v257_v59 = vmul.f32 %v1267_v54, %v256_v57  ;;  %v1454_v54 = vld [vmem:[#allocation2 + $0x110] sm:$0xff]   ;;  %v1457_v57 = vld [vmem:[#allocation2 + $0x178] sm:$0xff]  }
 0x1e6   :  { %v259_v60 = vadd.f32 %v258_v58, %v257_v59  ;;  %v1458_v58 = vld [vmem:[#allocation2 + $0x170] sm:$0xff]   ;;  %v1459_v59 = vld [vmem:[#allocation2 + $0x168] sm:$0xff]  }
 0x1e8   :  { %v261_v61 = vpack.c.bf16 %v259_v60, %v259_v60  ;;  %v613_v60 = vsub.s32 3, %v1637_v6 }
 0x1ea   :  { %1285 = vmatmul.mubr.bf16.vlgmr.msra.gmra.mxu0 %v261_v61  ;;  %v614_v61 = vrot.slane %v1643_v8, %v613_v60 }
 0x1eb   :  { %1324 = vmatprep.mubr.msk.bf16.mxu0 %vm1559_vm0, %v1558_v35  ;;  %1309 = vmatpush3.bf16.msra.mxu0 %v1433_v3 }
 0x1ec   :  { %1310 = vmatprep.subr.bf16.mxu0 %v1558_v35 }
 0x1ef   :  { %1311 = vmatpush3.bf16.msra.mxu0 %v1434_v4 }
 0x1f0   :  { %1312 = vmatprep.subr.bf16.mxu0 %v1558_v35 }
 0x1f3   :  { %1313 = vmatpush3.bf16.msra.mxu0 %v1435_v5  ;;  %v1460_v5 = vld [vmem:[#allocation2 + $0x160] sm:$0xff]  }
 0x1f4   :  { %1314 = vmatprep.subr.bf16.mxu0 %v1558_v35 }
 0x1f7   :  { %1315 = vmatpush3.bf16.msra.mxu0 %v1436_v17 }
 0x1f8   :  { %1316 = vmatprep.subr.bf16.mxu0 %v1558_v35 }
 0x1fb   :  { %1317 = vmatpush3.bf16.msra.mxu0 %v1437_v18 }
 0x1fc   :  { %1318 = vmatprep.subr.bf16.mxu0 %v1558_v35 }
 0x1ff   :  { %1319 = vmatpush3.bf16.msra.mxu0 %v1438_v19 }
 0x200   :  { %1320 = vmatprep.subr.bf16.mxu0 %v1558_v35 }
 0x203   :  { %1321 = vmatpush3.bf16.msra.mxu0 %v1439_v20 }
 0x204   :  { %1322 = vmatprep.subr.bf16.mxu0 %v1558_v35 }
 0x207   :  { %1323 = vmatpush3.bf16.msra.mxu0 %v1440_v21 }
 0x208   :  { %1348 = vmatprep.subr.bf16.mxu0 %v1558_v35 }
 0x2aa   :  { %v364_v10 = vpop.f32.mrf.mxu0 }
 0x2ab   :  { %v365_v11 = vadd.f32 %v364_v10, %v281_v9  ;;  %v1462_v9 = vld [vmem:[#allocation2 + $0x150] sm:$0xff]   ;;  %v1463_v10 = vld [vmem:[#allocation2 + $0x148] sm:$0xff]  }
 0x2ac   :  { %v1286_v12 = vpop.f32.mrf.mxu0 }
 0x2ad   :  { %1475 = vtanh.f32 %v365_v11  ;;  %v1464_v11 = vld [vmem:[#allocation2 + $0x140] sm:$0xff]   ;;  %v1465_v12 = vld [vmem:[#allocation2 + $0x1b8] sm:$0xff]  }
 0x2ae   :  { %v367_v13 = vpop.f32.mrf.mxu0 }
 0x2af   :  { %v1466_v13 = vld [vmem:[#allocation2 + $0x1b0] sm:$0xff]  }
 0x2b0   :  { %v1287_v14 = vpop.f32.mrf.mxu0 }
 0x2b1   :  { %v1467_v14 = vld [vmem:[#allocation2 + $0x1a8] sm:$0xff]  }
 0x2ba   :  { %v1476_v15 = vpop.eup %1475 }
 0x2bb   :  { %v371_v16 = vpack.c.bf16 %v1476_v15, %v1476_v15  ;;  %v724_v15 = vsub.s32 4, %v1637_v6 }
 0x2bd   :  { %1305 = vmatmul.mubr.bf16.vlgmr.msra.gmra.mxu1 %v371_v16  ;;  %v725_v16 = vrot.slane %v1643_v8, %v724_v15 }
 0x2be   :  { %1344 = vmatprep.mubr.msk.bf16.mxu1 %vm1559_vm0, %v1558_v35  ;;  %1329 = vmatpush3.bf16.msra.mxu1 %v1441_v22 }
 0x2bf   :  { %1330 = vmatprep.subr.bf16.mxu1 %v1558_v35 }
 0x2c2   :  { %1331 = vmatpush3.bf16.msra.mxu1 %v1442_v23 }
 0x2c3   :  { %1332 = vmatprep.subr.bf16.mxu1 %v1558_v35 }
 0x2c6   :  { %1333 = vmatpush3.bf16.msra.mxu1 %v1443_v24  ;;  %v1468_v24 = vld [vmem:[#allocation2 + $0x1a0] sm:$0xff]  }
 0x2c7   :  { %1334 = vmatprep.subr.bf16.mxu1 %v1558_v35 }
 0x2ca   :  { %1335 = vmatpush3.bf16.msra.mxu1 %v1444_v34 }
 0x2cb   :  { %1336 = vmatprep.subr.bf16.mxu1 %v1558_v35 }
 0x2ce   :  { %1337 = vmatpush3.bf16.msra.mxu1 %v1445_v36 }
 0x2cf   :  { %1338 = vmatprep.subr.bf16.mxu1 %v1558_v35 }
 0x2d2   :  { %1339 = vmatpush3.bf16.msra.mxu1 %v1446_v37 }
 0x2d3   :  { %1340 = vmatprep.subr.bf16.mxu1 %v1558_v35 }
 0x2d6   :  { %1341 = vmatpush3.bf16.msra.mxu1 %v1447_v38 }
 0x2d7   :  { %1342 = vmatprep.subr.bf16.mxu1 %v1558_v35 }
 0x2da   :  { %1343 = vmatpush3.bf16.msra.mxu1 %v1448_v39  ;;  %v946_v39 = vsub.s32 6, %v1637_v6 }
 0x2db   :  { %1368 = vmatprep.subr.bf16.mxu1 %v1558_v35 }
 0x37d   :  { %v475_v27 = vpop.f32.mrf.mxu1 }
 0x37e   :  { %v476_v28 = vadd.f32 %v475_v27, %v392_v26  ;;  %v1470_v26 = vld [vmem:[#allocation2 + $0x190] sm:$0xff]   ;;  %v1471_v27 = vld [vmem:[#allocation2 + $0x188] sm:$0xff]  }
 0x37f   :  { %v1306_v29 = vpop.f32.mrf.mxu1 }
 0x380   :  { %1477 = vtanh.f32 %v476_v28  ;;  %v1472_v28 = vld [vmem:[#allocation2 + $0x180] sm:$0xff]   ;;  %v835_v29 = vsub.s32 5, %v1637_v6 }
 0x381   :  { %v478_v30 = vpop.f32.mrf.mxu1 }
 0x382   :  { %v836_v30 = vrot.slane %v1643_v8, %v835_v29 }
 0x383   :  { %v1307_v31 = vpop.f32.mrf.mxu1 }
 0x38d   :  { %v1478_v32 = vpop.eup %1477 }
 0x38e   :  { %v482_v33 = vpack.c.bf16 %v1478_v32, %v1478_v32 }
 0x390   :  { %1325 = vmatmul.mubr.bf16.vlgmr.msra.gmra.mxu0 %v482_v33 }
 0x391   :  { %1364 = vmatprep.mubr.msk.bf16.mxu0 %vm1559_vm0, %v1558_v35  ;;  %1349 = vmatpush3.bf16.msra.mxu0 %v1449_v40  ;;  %v947_v40 = vrot.slane %v1643_v8, %v946_v39 }
 0x392   :  { %1350 = vmatprep.subr.bf16.mxu0 %v1558_v35 }
 0x395   :  { %1351 = vmatpush3.bf16.msra.mxu0 %v1450_v41 }
 0x396   :  { %1352 = vmatprep.subr.bf16.mxu0 %v1558_v35 }
 0x399   :  { %1353 = vmatpush3.bf16.msra.mxu0 %v1451_v42 }
 0x39a   :  { %1354 = vmatprep.subr.bf16.mxu0 %v1558_v35 }
 0x39d   :  { %1355 = vmatpush3.bf16.msra.mxu0 %v1452_v52 }
 0x39e   :  { %1356 = vmatprep.subr.bf16.mxu0 %v1558_v35 }
 0x3a1   :  { %1357 = vmatpush3.bf16.msra.mxu0 %v1453_v53 }
 0x3a2   :  { %1358 = vmatprep.subr.bf16.mxu0 %v1558_v35 }
 0x3a5   :  { %1359 = vmatpush3.bf16.msra.mxu0 %v1454_v54 }
 0x3a6   :  { %1360 = vmatprep.subr.bf16.mxu0 %v1558_v35 }
 0x3a9   :  { %1361 = vmatpush3.bf16.msra.mxu0 %v1455_v55 }
 0x3aa   :  { %1362 = vmatprep.subr.bf16.mxu0 %v1558_v35 }
 0x3ad   :  { %1363 = vmatpush3.bf16.msra.mxu0 %v1456_v56 }
 0x3ae   :  { %1388 = vmatprep.subr.bf16.mxu0 %v1558_v35 }
 0x450   :  { %v586_v45 = vpop.f32.mrf.mxu0 }
 0x451   :  { %v587_v46 = vadd.f32 %v586_v45, %v503_v44 }
 0x452   :  { %v1326_v47 = vpop.f32.mrf.mxu0 }
 0x453   :  { %1479 = vtanh.f32 %v587_v46 }
 0x454   :  { %v589_v48 = vpop.f32.mrf.mxu0 }
 0x456   :  { %v1327_v49 = vpop.f32.mrf.mxu0 }
 0x460   :  { %v1480_v50 = vpop.eup %1479 }
 0x461   :  { %v593_v51 = vpack.c.bf16 %v1480_v50, %v1480_v50 }
 0x463   :  { %1345 = vmatmul.mubr.bf16.vlgmr.msra.gmra.mxu1 %v593_v51 }
 0x464   :  { %1384 = vmatprep.mubr.msk.bf16.mxu1 %vm1559_vm0, %v1558_v35  ;;  %1369 = vmatpush3.bf16.msra.mxu1 %v1457_v57 }
 0x465   :  { %1370 = vmatprep.subr.bf16.mxu1 %v1558_v35 }
 0x468   :  { %1371 = vmatpush3.bf16.msra.mxu1 %v1458_v58 }
 0x469   :  { %1372 = vmatprep.subr.bf16.mxu1 %v1558_v35 }
 0x46c   :  { %1373 = vmatpush3.bf16.msra.mxu1 %v1459_v59 }
 0x46d   :  { %1374 = vmatprep.subr.bf16.mxu1 %v1558_v35 }
 0x470   :  { %1375 = vmatpush3.bf16.msra.mxu1 %v1460_v5 }
 0x471   :  { %1376 = vmatprep.subr.bf16.mxu1 %v1558_v35 }
 0x474   :  { %1377 = vmatpush3.bf16.msra.mxu1 %v1461_v7 }
 0x475   :  { %1378 = vmatprep.subr.bf16.mxu1 %v1558_v35 }
 0x478   :  { %1379 = vmatpush3.bf16.msra.mxu1 %v1462_v9 }
 0x479   :  { %1380 = vmatprep.subr.bf16.mxu1 %v1558_v35 }
 0x47c   :  { %1381 = vmatpush3.bf16.msra.mxu1 %v1463_v10 }
 0x47d   :  { %1382 = vmatprep.subr.bf16.mxu1 %v1558_v35 }
 0x480   :  { %1383 = vmatpush3.bf16.msra.mxu1 %v1464_v11 }
 0x523   :  { %v697_v62 = vpop.f32.mrf.mxu1 }
 0x524   :  { %v698_v63 = vadd.f32 %v697_v62, %v614_v61 }
 0x525   :  { %v1346_v0 = vpop.f32.mrf.mxu1 }
 0x526   :  { %1481 = vtanh.f32 %v698_v63 }
 0x527   :  { %v700_v1 = vpop.f32.mrf.mxu1 }
 0x529   :  { %v1347_v2 = vpop.f32.mrf.mxu1 }
 0x533   :  { %v1482_v3 = vpop.eup %1481 }
 0x534   :  { %v704_v4 = vpack.c.bf16 %v1482_v3, %v1482_v3 }
 0x536   :  { %1365 = vmatmul.mubr.bf16.vlgmr.msra.gmra.mxu0 %v704_v4 }
 0x537   :  { %1404 = vmatprep.mubr.msk.bf16.mxu0 %vm1559_vm0, %v1558_v35  ;;  %1389 = vmatpush3.bf16.msra.mxu0 %v1465_v12 }
 0x538   :  { %1390 = vmatprep.subr.bf16.mxu0 %v1558_v35 }
 0x53b   :  { %1391 = vmatpush3.bf16.msra.mxu0 %v1466_v13 }
 0x53c   :  { %1392 = vmatprep.subr.bf16.mxu0 %v1558_v35 }
 0x53f   :  { %1393 = vmatpush3.bf16.msra.mxu0 %v1467_v14 }
 0x540   :  { %1394 = vmatprep.subr.bf16.mxu0 %v1558_v35 }
 0x543   :  { %1395 = vmatpush3.bf16.msra.mxu0 %v1468_v24 }
 0x544   :  { %1396 = vmatprep.subr.bf16.mxu0 %v1558_v35 }
 0x547   :  { %1397 = vmatpush3.bf16.msra.mxu0 %v1469_v25 }
 0x548   :  { %1398 = vmatprep.subr.bf16.mxu0 %v1558_v35 }
 0x54b   :  { %1399 = vmatpush3.bf16.msra.mxu0 %v1470_v26 }
 0x54c   :  { %1400 = vmatprep.subr.bf16.mxu0 %v1558_v35 }
 0x54f   :  { %1401 = vmatpush3.bf16.msra.mxu0 %v1471_v27 }
 0x550   :  { %1402 = vmatprep.subr.bf16.mxu0 %v1558_v35 }
 0x553   :  { %1403 = vmatpush3.bf16.msra.mxu0 %v1472_v28 }
 0x5f6   :  { %v808_v17 = vpop.f32.mrf.mxu0 }
 0x5f7   :  { %v809_v18 = vadd.f32 %v808_v17, %v725_v16 }
 0x5f8   :  { %v1366_v19 = vpop.f32.mrf.mxu0 }
 0x5f9   :  { %1483 = vtanh.f32 %v809_v18 }
 0x5fa   :  { %v811_v20 = vpop.f32.mrf.mxu0 }
 0x5fc   :  { %v1367_v21 = vpop.f32.mrf.mxu0 }
 0x606   :  { %v1484_v22 = vpop.eup %1483 }
 0x607   :  { %v815_v23 = vpack.c.bf16 %v1484_v22, %v1484_v22 }
 0x609   :  { %1385 = vmatmul.mubr.bf16.vlgmr.msra.gmra.mxu1 %v815_v23 }
 0x6c9   :  { %v919_v31 = vpop.f32.mrf.mxu1 }
 0x6ca   :  { %v920_v32 = vadd.f32 %v919_v31, %v836_v30 }
 0x6cb   :  { %v1386_v33 = vpop.f32.mrf.mxu1 }
 0x6cc   :  { %1485 = vtanh.f32 %v920_v32 }
 0x6cd   :  { %v922_v34 = vpop.f32.mrf.mxu1 }
 0x6cf   :  { %v1387_v36 = vpop.f32.mrf.mxu1 }
 0x6d9   :  { %v1486_v37 = vpop.eup %1485 }
 0x6da   :  { %v926_v38 = vpack.c.bf16 %v1486_v37, %v1486_v37 }
 0x6dc   :  { %1405 = vmatmul.mubr.bf16.vlgmr.msra.gmra.mxu0 %v926_v38 }
 0x79c   :  { %v1030_v35 = vpop.f32.mrf.mxu0 }
 0x79d   :  { %v1031_v41 = vadd.f32 %v1030_v35, %v947_v40 }
 0x79e   :  { %v1406_v42 = vpop.f32.mrf.mxu0 }
 0x79f   :  { %1036 = vst [vmem:[%s1709_s5] sm:$0xff] %v1031_v41 }
 0x7a0   :  { %v1033_v43 = vpop.f32.mrf.mxu0 }
 0x7a2   :  { %v1407_v44 = vpop.f32.mrf.mxu0 }
 0x7a3   :  { %1041 = vsyncpa [#allocation3], 1 }
 0x7a4   :  { %1042 = vsyncpa [#allocation5], 1 }

</bundles_post_ra>
